<compile_context>
chip_gen: v7x
topology: tpu7x:2x2x1
jax: 0.10.0
libtpu: 0.0.40
codegen_flags: <defaults>
</compile_context>

<pallas_src>
import functools

import jax
import jax.numpy as jnp
from jax.experimental import pallas as pl
from jax.experimental.pallas import tpu as pltpu


def _round_up(x, m):
    return ((x + m - 1) // m) * m


def _gru_cell(x, h, wi_t, wh_t, bi, bh, hidden):
    """PyTorch-semantics GRUCell on a (tile_n, H) row tile."""
    gi = jnp.dot(x, wi_t, preferred_element_type=jnp.float32) + bi   # (tile_n, 3H)
    gh = jnp.dot(h, wh_t, preferred_element_type=jnp.float32) + bh   # (tile_n, 3H)
    H = hidden
    r = jax.nn.sigmoid(gi[:, 0:H] + gh[:, 0:H])
    z = jax.nn.sigmoid(gi[:, H:2 * H] + gh[:, H:2 * H])
    n = jnp.tanh(gi[:, 2 * H:3 * H] + r * gh[:, 2 * H:3 * H])
    return (1.0 - z) * n + z * h


def _ggnn_layer_kernel(seed_ref, *refs, hidden, dropout, training, use_node_types):
    if use_node_types:
        (x_ref, h_ref, nt_ref,
         wi0_ref, wh0_ref, bi0_ref, bh0_ref,
         wi1_ref, wh1_ref, bi1_ref, bh1_ref,
         out_ref) = refs
    else:
        (x_ref, h_ref, wi_ref, wh_ref, bi_ref, bh_ref, out_ref) = refs

    x = x_ref[...]
    h = h_ref[...]

    if use_node_types:
        out_stmt = _gru_cell(x, h, wi0_ref[...], wh0_ref[...],
                             bi0_ref[...], bh0_ref[...], hidden)
        out_id = _gru_cell(x, h, wi1_ref[...], wh1_ref[...],
                           bi1_ref[...], bh1_ref[...], hidden)
        nt = nt_ref[...]                                   # (tile_n, 1) int32
        out = jnp.where(nt == 0, out_stmt,
                        jnp.where(nt == 1, out_id, 0.0))
    else:
        out = _gru_cell(x, h, wi_ref[...], wh_ref[...],
                        bi_ref[...], bh_ref[...], hidden)

    # F.dropout(out, p, training) -- only traced in training mode.
    if training and dropout > 0.0:
        pltpu.prng_seed(seed_ref[0] + pl.program_id(0))
        bits = pltpu.prng_random_bits(out.shape)
        u = (bits.astype(jnp.uint32) >> 9).astype(jnp.float32) * (1.0 / (1 << 23))
        keep = u >= jnp.float32(dropout)
        out = jnp.where(keep, out * (1.0 / (1.0 - dropout)), 0.0)

    out_ref[...] = out.astype(out_ref.dtype)


def ggnn_layer(messages, node_states, params, *, node_types=None,
               dropout=0.0, training=False, seed=0, tile_n=512):
    """Pallas equivalent of GGNNLayer.forward."""
    n, hidden = messages.shape
    assert node_states.shape == (n, hidden)
    use_node_types = node_types is not None

    messages = messages.astype(jnp.float32)
    node_states = node_states.astype(jnp.float32)

    # Row tile: multiple of 8 sublanes, no bigger than needed.
    tile_n = _round_up(max(8, min(int(tile_n), _round_up(n, 8))), 8)
    n_pad = _round_up(n, tile_n)
    grid = (n_pad // tile_n,)

    pad = n_pad - n
    if pad:
        messages = jnp.pad(messages, ((0, pad), (0, 0)))
        node_states = jnp.pad(node_states, ((0, pad), (0, 0)))

    def _prep(w_ih, w_hh, b_ih, b_hh):
        return (jnp.asarray(w_ih, jnp.float32).T,           # (H, 3H)
                jnp.asarray(w_hh, jnp.float32).T,           # (H, 3H)
                jnp.asarray(b_ih, jnp.float32).reshape(1, -1),
                jnp.asarray(b_hh, jnp.float32).reshape(1, -1))

    wi_t, wh_t, bi, bh = _prep(params["w_ih"], params["w_hh"],
                               params["b_ih"], params["b_hh"])

    row_spec = pl.BlockSpec((tile_n, hidden), lambda i, s: (i, 0))
    w_spec = pl.BlockSpec((hidden, 3 * hidden), lambda i, s: (0, 0))
    b_spec = pl.BlockSpec((1, 3 * hidden), lambda i, s: (0, 0))

    args = [messages, node_states]
    in_specs = [row_spec, row_spec]
    if use_node_types:
        nt = jnp.asarray(node_types, jnp.int32).reshape(n, 1)
        if pad:
            nt = jnp.pad(nt, ((0, pad), (0, 0)), constant_values=-1)
        args.append(nt)
        in_specs.append(pl.BlockSpec((tile_n, 1), lambda i, s: (i, 0)))
        wi1_t, wh1_t, bi1, bh1 = _prep(params["id_w_ih"], params["id_w_hh"],
                                       params["id_b_ih"], params["id_b_hh"])
        args += [wi_t, wh_t, bi, bh, wi1_t, wh1_t, bi1, bh1]
        in_specs += [w_spec, w_spec, b_spec, b_spec,
                     w_spec, w_spec, b_spec, b_spec]
        n_grus = 2
    else:
        args += [wi_t, wh_t, bi, bh]
        in_specs += [w_spec, w_spec, b_spec, b_spec]
        n_grus = 1

    # Memory-bound roofline hint for the XLA scheduler.
    flops = n_grus * 2 * (2 * n_pad * hidden * 3 * hidden)
    transcendentals = n_grus * 3 * n_pad * hidden
    bytes_accessed = 4 * (3 * n_pad * hidden
                          + n_grus * (2 * hidden * 3 * hidden + 2 * 3 * hidden))

    kernel = functools.partial(
        _ggnn_layer_kernel, hidden=hidden, dropout=float(dropout),
        training=bool(training), use_node_types=use_node_types)

    out = pl.pallas_call(
        kernel,
        out_shape=jax.ShapeDtypeStruct((n_pad, hidden), jnp.float32),
        grid_spec=pltpu.PrefetchScalarGridSpec(
            num_scalar_prefetch=1,
            grid=grid,
            in_specs=in_specs,
            out_specs=row_spec,
        ),
        compiler_params=pltpu.CompilerParams(
            dimension_semantics=("parallel",),
            vmem_limit_bytes=32 * 1024 * 1024,
        ),
        cost_estimate=pl.CostEstimate(flops=flops,
                                      transcendentals=transcendentals,
                                      bytes_accessed=bytes_accessed),
    )(jnp.asarray([seed], jnp.int32), *args)

    return out[:n]


# ----------------------------------------------------------------------------
# Pure-JAX reference mirroring the PyTorch module (eval mode).
# ----------------------------------------------------------------------------
def _gru_ref(x, h, w_ih, w_hh, b_ih, b_hh):
    H = h.shape[1]
    gi = x @ w_ih.T + b_ih
    gh = h @ w_hh.T + b_hh
    r = jax.nn.sigmoid(gi[:, :H] + gh[:, :H])
    z = jax.nn.sigmoid(gi[:, H:2 * H] + gh[:, H:2 * H])
    n = jnp.tanh(gi[:, 2 * H:] + r * gh[:, 2 * H:])
    return (1.0 - z) * n + z * h


def _reference(messages, node_states, params, node_types=None):
    out = _gru_ref(messages, node_states, params["w_ih"], params["w_hh"],
                   params["b_ih"], params["b_hh"])
    if node_types is None:
        return out
    out_id = _gru_ref(messages, node_states, params["id_w_ih"], params["id_w_hh"],
                      params["id_b_ih"], params["id_b_hh"])
    nt = node_types[:, None]
    return jnp.where(nt == 0, out, jnp.where(nt == 1, out_id, 0.0))


if __name__ == "__main__":
    key = jax.random.PRNGKey(0)
    ks = jax.random.split(key, 11)

    N, H = 200, 64          # ragged node count (not a tile multiple), small hidden
    scale = 1.0 / float(jnp.sqrt(H))

    def uni(k, shape):
        return jax.random.uniform(k, shape, jnp.float32, -scale, scale)

    messages = jax.random.normal(ks[0], (N, H), jnp.float32)
    node_states = jax.random.normal(ks[1], (N, H), jnp.float32)
    node_types = jax.random.randint(ks[2], (N,), 0, 2)

    params = {
        "w_ih": uni(ks[3], (3 * H, H)),
        "w_hh": uni(ks[4], (3 * H, H)),
        "b_ih": uni(ks[5], (3 * H,)),
        "b_hh": uni(ks[6], (3 * H,)),
        "id_w_ih": uni(ks[7], (3 * H, H)),
        "id_w_hh": uni(ks[8], (3 * H, H)),
        "id_b_ih": uni(ks[9], (3 * H,)),
        "id_b_hh": uni(ks[10], (3 * H,)),
    }

    # Case 1: plain GRU (use_node_types = False), eval mode (dropout identity).
    out1 = jax.block_until_ready(
        ggnn_layer(messages, node_states, params, dropout=0.2, training=False,
                   tile_n=128))
    ref1 = _reference(messages, node_states, params)
    assert out1.shape == (N, H)
    assert jnp.allclose(out1, ref1, rtol=2e-2, atol=2e-2), \
        float(jnp.max(jnp.abs(out1 - ref1)))

    # Case 2: per-node-type GRU selection (gru / id_gru).
    out2 = jax.block_until_ready(
        ggnn_layer(messages, node_states, params, node_types=node_types,
                   tile_n=128))
    ref2 = _reference(messages, node_states, params, node_types)
    assert jnp.allclose(out2, ref2, rtol=2e-2, atol=2e-2), \
        float(jnp.max(jnp.abs(out2 - ref2)))

    print("KERNEL_OK")
</pallas_src>

<mosaic_0001>
module attributes {stable_mosaic.version = 11 : i64} {
  func.func @_ggnn_layer_kernel(%arg0: i32, %arg1: memref<1xi32, #tpu.memory_space<smem>>, %arg2: memref<128x64xf32, #tpu.memory_space<vmem>>, %arg3: memref<128x64xf32, #tpu.memory_space<vmem>>, %arg4: memref<64x192xf32, #tpu.memory_space<vmem>>, %arg5: memref<64x192xf32, #tpu.memory_space<vmem>>, %arg6: memref<1x192xf32, #tpu.memory_space<vmem>>, %arg7: memref<1x192xf32, #tpu.memory_space<vmem>>, %arg8: memref<128x64xf32, #tpu.memory_space<vmem>>) attributes {dimension_semantics = [#tpu.dimension_semantics<parallel>], iteration_bounds = array<i64: 2>, scalar_prefetch = 1 : i64, scratch_operands = 0 : i64, tpu.core_type = #tpu.core_type<tc>, window_params = [{transform_indices = @transform_0, window_bounds = array<i64: 128, 64>}, {transform_indices = @transform_1, window_bounds = array<i64: 128, 64>}, {pipeline_mode = #tpu.pipeline_mode<synchronous>, transform_indices = @transform_2, window_bounds = array<i64: 64, 192>}, {pipeline_mode = #tpu.pipeline_mode<synchronous>, transform_indices = @transform_3, window_bounds = array<i64: 64, 192>}, {pipeline_mode = #tpu.pipeline_mode<synchronous>, transform_indices = @transform_4, window_bounds = array<i64: 1, 192>}, {pipeline_mode = #tpu.pipeline_mode<synchronous>, transform_indices = @transform_5, window_bounds = array<i64: 1, 192>}, {transform_indices = @transform_6, window_bounds = array<i64: 128, 64>}]} {
    %c0 = arith.constant 0 : index
    %c0_0 = arith.constant 0 : index
    %0 = vector.load %arg2[%c0, %c0_0] : memref<128x64xf32, #tpu.memory_space<vmem>>, vector<128x64xf32>
    %c0_1 = arith.constant 0 : index
    %c0_2 = arith.constant 0 : index
    %1 = vector.load %arg3[%c0_1, %c0_2] : memref<128x64xf32, #tpu.memory_space<vmem>>, vector<128x64xf32>
    %c0_3 = arith.constant 0 : index
    %c0_4 = arith.constant 0 : index
    %2 = vector.load %arg4[%c0_3, %c0_4] : memref<64x192xf32, #tpu.memory_space<vmem>>, vector<64x192xf32>
    %c0_5 = arith.constant 0 : index
    %c0_6 = arith.constant 0 : index
    %3 = vector.load %arg5[%c0_5, %c0_6] : memref<64x192xf32, #tpu.memory_space<vmem>>, vector<64x192xf32>
    %c0_7 = arith.constant 0 : index
    %c0_8 = arith.constant 0 : index
    %4 = vector.load %arg6[%c0_7, %c0_8] : memref<1x192xf32, #tpu.memory_space<vmem>>, vector<1x192xf32>
    %c0_9 = arith.constant 0 : index
    %c0_10 = arith.constant 0 : index
    %5 = vector.load %arg7[%c0_9, %c0_10] : memref<1x192xf32, #tpu.memory_space<vmem>>, vector<1x192xf32>
    %cst = arith.constant dense<0.000000e+00> : vector<128x192xf32>
    %6 = tpu.matmul %0, %2, %cst {dimension_numbers = #tpu.dot_dimension_numbers<[1], [0], [0], [1], [0, 0, 1, 1], [], []>} : vector<128x64xf32>, vector<64x192xf32>, vector<128x192xf32> -> vector<128x192xf32>
    %7 = vector.broadcast %4 : vector<1x192xf32> to vector<128x192xf32>
    %8 = arith.addf %6, %7 : vector<128x192xf32>
    %cst_11 = arith.constant dense<0.000000e+00> : vector<128x192xf32>
    %9 = tpu.matmul %1, %3, %cst_11 {dimension_numbers = #tpu.dot_dimension_numbers<[1], [0], [0], [1], [0, 0, 1, 1], [], []>} : vector<128x64xf32>, vector<64x192xf32>, vector<128x192xf32> -> vector<128x192xf32>
    %10 = vector.broadcast %5 : vector<1x192xf32> to vector<128x192xf32>
    %11 = arith.addf %9, %10 : vector<128x192xf32>
    %12 = vector.extract_strided_slice %8 {offsets = [0, 0], sizes = [128, 64], strides = [1, 1]} : vector<128x192xf32> to vector<128x64xf32>
    %13 = vector.extract_strided_slice %11 {offsets = [0, 0], sizes = [128, 64], strides = [1, 1]} : vector<128x192xf32> to vector<128x64xf32>
    %14 = arith.addf %12, %13 : vector<128x64xf32>
    %15 = arith.negf %14 : vector<128x64xf32>
    %16 = math.exp %15 : vector<128x64xf32>
    %cst_12 = arith.constant 1.000000e+00 : f32
    %17 = vector.broadcast %cst_12 : f32 to vector<128x64xf32>
    %18 = arith.addf %17, %16 : vector<128x64xf32>
    %19 = arith.divf %17, %18 : vector<128x64xf32>
    %20 = vector.extract_strided_slice %8 {offsets = [0, 64], sizes = [128, 64], strides = [1, 1]} : vector<128x192xf32> to vector<128x64xf32>
    %21 = vector.extract_strided_slice %11 {offsets = [0, 64], sizes = [128, 64], strides = [1, 1]} : vector<128x192xf32> to vector<128x64xf32>
    %22 = arith.addf %20, %21 : vector<128x64xf32>
    %23 = arith.negf %22 : vector<128x64xf32>
    %24 = math.exp %23 : vector<128x64xf32>
    %cst_13 = arith.constant 1.000000e+00 : f32
    %25 = vector.broadcast %cst_13 : f32 to vector<128x64xf32>
    %26 = arith.addf %25, %24 : vector<128x64xf32>
    %27 = arith.divf %25, %26 : vector<128x64xf32>
    %28 = vector.extract_strided_slice %8 {offsets = [0, 128], sizes = [128, 64], strides = [1, 1]} : vector<128x192xf32> to vector<128x64xf32>
    %29 = vector.extract_strided_slice %11 {offsets = [0, 128], sizes = [128, 64], strides = [1, 1]} : vector<128x192xf32> to vector<128x64xf32>
    %30 = arith.mulf %19, %29 : vector<128x64xf32>
    %31 = arith.addf %28, %30 : vector<128x64xf32>
    %32 = math.tanh %31 : vector<128x64xf32>
    %cst_14 = arith.constant 1.000000e+00 : f32
    %33 = vector.broadcast %cst_14 : f32 to vector<128x64xf32>
    %34 = arith.subf %33, %27 : vector<128x64xf32>
    %35 = arith.mulf %34, %32 : vector<128x64xf32>
    %36 = arith.mulf %27, %1 : vector<128x64xf32>
    %37 = arith.addf %35, %36 : vector<128x64xf32>
    %c0_15 = arith.constant 0 : index
    %c0_16 = arith.constant 0 : index
    %38 = vector.load %arg8[%c0_15, %c0_16] : memref<128x64xf32, #tpu.memory_space<vmem>>, vector<128x64xf32>
    tpu.vector_store %arg8[%c0_15, %c0_16], %37 {strides = array<i32>} : memref<128x64xf32, #tpu.memory_space<vmem>>, vector<128x64xf32>,
    return
  }
  func.func @transform_0(%arg0: i32, %arg1: memref<1xi32, #tpu.memory_space<smem>>) -> (i32, i32) {
    %c0_i32 = arith.constant 0 : i32
    %c0_i32_0 = arith.constant 0 : i32
    return %arg0, %c0_i32 : i32, i32
  }
  func.func @transform_1(%arg0: i32, %arg1: memref<1xi32, #tpu.memory_space<smem>>) -> (i32, i32) {
    %c0_i32 = arith.constant 0 : i32
    %c0_i32_0 = arith.constant 0 : i32
    return %arg0, %c0_i32 : i32, i32
  }
  func.func @transform_2(%arg0: i32, %arg1: memref<1xi32, #tpu.memory_space<smem>>) -> (i32, i32) {
    %c0_i32 = arith.constant 0 : i32
    %c0_i32_0 = arith.constant 0 : i32
    %c0_i32_1 = arith.constant 0 : i32
    return %c0_i32, %c0_i32_0 : i32, i32
  }
  func.func @transform_3(%arg0: i32, %arg1: memref<1xi32, #tpu.memory_space<smem>>) -> (i32, i32) {
    %c0_i32 = arith.constant 0 : i32
    %c0_i32_0 = arith.constant 0 : i32
    %c0_i32_1 = arith.constant 0 : i32
    return %c0_i32, %c0_i32_0 : i32, i32
  }
  func.func @transform_4(%arg0: i32, %arg1: memref<1xi32, #tpu.memory_space<smem>>) -> (i32, i32) {
    %c0_i32 = arith.constant 0 : i32
    %c0_i32_0 = arith.constant 0 : i32
    %c0_i32_1 = arith.constant 0 : i32
    return %c0_i32, %c0_i32_0 : i32, i32
  }
  func.func @transform_5(%arg0: i32, %arg1: memref<1xi32, #tpu.memory_space<smem>>) -> (i32, i32) {
    %c0_i32 = arith.constant 0 : i32
    %c0_i32_0 = arith.constant 0 : i32
    %c0_i32_1 = arith.constant 0 : i32
    return %c0_i32, %c0_i32_0 : i32, i32
  }
  func.func @transform_6(%arg0: i32, %arg1: memref<1xi32, #tpu.memory_space<smem>>) -> (i32, i32) {
    %c0_i32 = arith.constant 0 : i32
    %c0_i32_0 = arith.constant 0 : i32
    return %arg0, %c0_i32 : i32, i32
  }
}

</mosaic_0001>

<bundles_post_ra>
// kernel: tpu_custom_call.1
= control target key start
LH: loop header
LB: loop body
LE: loop exit
PB: predicated region body
PF: predicated region fallthrough
CT: control target
= control target key end

     0   :  { %s1519_s23 = smov 0   ;;  %s2108_s0 = inlined_call_operand.<no memory space> [shape: s32[1], index: 0, kind: input, shape index: {}]   ;;  %s2109_s1 = inlined_call_operand.vmem [shape: f32[256,64], index: 1, kind: input, shape index: {}]   ;;  %s2110_s2 = inlined_call_operand.vmem [shape: f32[256,64], index: 2, kind: input, shape index: {}]   ;;  %s2111_s3 = inlined_call_operand.vmem [shape: f32[64,192], index: 3, kind: input, shape index: {}]   ;;  %s2112_s4 = inlined_call_operand.vmem [shape: f32[64,192], index: 4, kind: input, shape index: {}]   ;;  %s2113_s5 = inlined_call_operand.vmem [shape: f32[1,192], index: 5, kind: input, shape index: {}]   ;;  %s2114_s6 = inlined_call_operand.vmem [shape: f32[1,192], index: 6, kind: input, shape index: {}]   ;;  %s2115_s7 = inlined_call_operand.vmem [shape: f32[256,64], index: 7, kind: output, shape index: {}]  }
   0x1 LB: > { %s1270_s24 = sadd.s32 4294967295, %s1475_s23   ;;  %p1274_p0 = scmp.ge.s32.totalorder %s1475_s23, 1  ;;  %s1475_s23 = sphi %s1519_s23, %s18_s23  }
   0x2   : > { %p226_p1 = scmp.lt.s32.totalorder %s1475_s23, 3 }
   0x4   : > { %p227_p2 = pnand %p1274_p0, %p226_p1 }
   0x5   : > { %v312_v0 = vld [vmem:[%s2111_s3 + $0x8] sm:$0xff] (!%p227_p2)  ;;  %v314_v1 = vld [vmem:[%s2111_s3 + $0x18] sm:$0xff] (!%p227_p2)  ;;  %s1275_s8 = sshll.u32 (!%p227_p2), %s1270_s24, 4  ;;  %v311_v5 = vld [vmem:[%s2111_s3] sm:$0xff] (!%p227_p2)  ;;  %v1477_v7 = vmov (!%p227_p2), 0.0   ;;  %s1478_s26 = smov (!%p227_p2), 64  }
   0x6   : > { %230 = sbr.rel (%p227_p2) target bundleno = 583 (0x247), region = 44  ;;  %v328_v2 = vld [vmem:[%s2112_s4 + $0x8] sm:$0xff] (!%p227_p2)  ;;  %v1331_v3 = vpack.c.bf16 (!%p227_p2), %v314_v1, %v312_v0  ;;  %v330_v4 = vld [vmem:[%s2112_s4 + $0x18] sm:$0xff] (!%p227_p2)  ;;  %v313_v6 = vld [vmem:[%s2111_s3 + $0x10] sm:$0xff] (!%p227_p2)  ;;  %469 = vmatprep.mubr.f32.mxu0 (!%p227_p2), %v1477_v7  ;;  %689 = vmatprep.mubr.f32.mxu1 (!%p227_p2), %v1477_v7  ;;  %p262_p3 = scmp.lt.s32.totalorder (!%p227_p2), %s1275_s8, 31  ;;  %vm356_vm0 = vcmask (!%p227_p2), 523264  }
   0x7   : > { %v1347_v8 = vpack.c.bf16 (!%p227_p2), %v330_v4, %v328_v2  ;;  %v1333_v9 = vpack.c.bf16 (!%p227_p2), %v313_v6, %v311_v5  ;;  %v327_v10 = vld [vmem:[%s2112_s4] sm:$0xff] (!%p227_p2)  ;;  %v329_v11 = vld [vmem:[%s2112_s4 + $0x10] sm:$0xff] (!%p227_p2)  ;;  %v316_v12 = vld [vmem:[%s2111_s3 + $0x28] sm:$0xff] (!%p227_p2) }
   0x8   : > { %1332 = vmatprep.subr.bf16.mxu0 (!%p227_p2), %v1331_v3  ;;  %v1349_v13 = vpack.c.bf16 (!%p227_p2), %v329_v11, %v327_v10  ;;  %v318_v14 = vld [vmem:[%s2111_s3 + $0x38] sm:$0xff] (!%p227_p2)  ;;  %v332_v15 = vld [vmem:[%s2112_s4 + $0x28] sm:$0xff] (!%p227_p2)  ;;  %v315_v19 = vld [vmem:[%s2111_s3 + $0x20] sm:$0xff] (!%p227_p2) }
   0x9   : > { %v334_v16 = vld [vmem:[%s2112_s4 + $0x38] sm:$0xff] (!%p227_p2)  ;;  %1348 = vmatprep.subr.bf16.mxu1 (!%p227_p2), %v1347_v8  ;;  %1334 = vmatpush1.bf16.msra.mxu0 (!%p227_p2), %v1333_v9  ;;  %v1335_v17 = vpack.c.bf16 (!%p227_p2), %v318_v14, %v316_v12  ;;  %v317_v20 = vld [vmem:[%s2111_s3 + $0x30] sm:$0xff] (!%p227_p2)  ;;  %v331_v21 = vld [vmem:[%s2112_s4 + $0x20] sm:$0xff] (!%p227_p2) }
   0xa   : > { %v1351_v18 = vpack.c.bf16 (!%p227_p2), %v334_v16, %v332_v15  ;;  %1350 = vmatpush1.bf16.msra.mxu1 (!%p227_p2), %v1349_v13  ;;  %v1337_v22 = vpack.c.bf16 (!%p227_p2), %v317_v20, %v315_v19  ;;  %v333_v23 = vld [vmem:[%s2112_s4 + $0x30] sm:$0xff] (!%p227_p2)  ;;  %v320_v24 = vld [vmem:[%s2111_s3 + $0x48] sm:$0xff] (!%p227_p2)  ;;  %v322_v25 = vld [vmem:[%s2111_s3 + $0x58] sm:$0xff] (!%p227_p2) }
   0xb   : > { %1336 = vmatprep.subr.bf16.mxu0 (!%p227_p2), %v1335_v17  ;;  %v1353_v26 = vpack.c.bf16 (!%p227_p2), %v333_v23, %v331_v21  ;;  %v1339_v27 = vpack.c.bf16 (!%p227_p2), %v322_v25, %v320_v24  ;;  %v336_v28 = vld [vmem:[%s2112_s4 + $0x48] sm:$0xff] (!%p227_p2)  ;;  %v338_v29 = vld [vmem:[%s2112_s4 + $0x58] sm:$0xff] (!%p227_p2)  ;;  %v319_v30 = vld [vmem:[%s2111_s3 + $0x40] sm:$0xff] (!%p227_p2) }
   0xc   : > { %1352 = vmatprep.subr.bf16.mxu1 (!%p227_p2), %v1351_v18  ;;  %v1355_v31 = vpack.c.bf16 (!%p227_p2), %v338_v29, %v336_v28  ;;  %v321_v32 = vld [vmem:[%s2111_s3 + $0x50] sm:$0xff] (!%p227_p2)  ;;  %v335_v33 = vld [vmem:[%s2112_s4 + $0x40] sm:$0xff] (!%p227_p2)  ;;  %v324_v36 = vld [vmem:[%s2111_s3 + $0x68] sm:$0xff] (!%p227_p2)  ;;  %v346_v18 = vlaneseq (!%p227_p2) }
   0xd   : > { %s2117_s8 = smov (!%p262_p3, %s1275_s8), 31  ;;  %v337_v34 = vld [vmem:[%s2112_s4 + $0x50] sm:$0xff]  ;;  %1338 = vmatpush1.bf16.msra.mxu0 %v1337_v22  ;;  %v1341_v35 = vpack.c.bf16 %v321_v32, %v319_v30  ;;  %v326_v37 = vld [vmem:[%s2111_s3 + $0x78] sm:$0xff]  ;;  %v340_v38 = vld [vmem:[%s2112_s4 + $0x68] sm:$0xff] }
   0xe   : > { %s1583_s17 = sshll.u32 %s2117_s8, 3  ;;  %1354 = vmatpush1.bf16.msra.mxu1 %v1353_v26  ;;  %1340 = vmatprep.subr.bf16.mxu0 %v1339_v27  ;;  %v1357_v39 = vpack.c.bf16 %v337_v34, %v335_v33  ;;  %v1343_v40 = vpack.c.bf16 %v326_v37, %v324_v36  ;;  %v342_v41 = vld [vmem:[%s2112_s4 + $0x78] sm:$0xff]  ;;  %v323_v42 = vld [vmem:[%s2111_s3 + $0x60] sm:$0xff]  ;;  %v325_v43 = vld [vmem:[%s2111_s3 + $0x70] sm:$0xff]  ;;  %v1753_v19 = vshrl.u32 %v346_v18, 7 }
   0xf   : > { %s1616_s15 = scalar_lea.vmem %s2110_s2, %s1583_s17  ;;  %1356 = vmatprep.subr.bf16.mxu1 %v1355_v31  ;;  %v1359_v44 = vpack.c.bf16 %v342_v41, %v340_v38  ;;  %v339_v45 = vld [vmem:[%s2112_s4 + $0x60] sm:$0xff]  ;;  %v341_v46 = vld [vmem:[%s2112_s4 + $0x70] sm:$0xff]  ;;  %v1345_v48 = vpack.c.bf16 %v325_v43, %v323_v42  ;;  %s1639_s29 = scalar_lea.vmem %s2109_s1, %s1583_s17 }
  0x10   : > { %v295_v47 = vld [vmem:[%s1616_s15] sm:$0xff]  ;;  %v1361_v49 = vpack.c.bf16 %v341_v46, %v339_v45  ;;  %v296_v50 = vld [vmem:[%s1616_s15 + $0x8] sm:$0xff]  ;;  %v297_v51 = vld [vmem:[%s1616_s15 + $0x10] sm:$0xff]  ;;  %v348_v20 = vsub.s32 0, %v1753_v19  ;;  %s2071_s14 = scalar_lea.vmem %s2115_s7, %s1583_s17 }
  0x11   : > { %1342 = vmatpush1.bf16.msra.mxu0 %v1341_v35  ;;  %1042 = vrot.lane.b32.xlu0 %v295_v47, %s1478_s26  ;;  %v279_v52 = vld [vmem:[%s1639_s29] sm:$0xff]  ;;  %v298_v53 = vld [vmem:[%s1616_s15 + $0x18] sm:$0xff]  ;;  %v280_v54 = vld [vmem:[%s1639_s29 + $0x8] sm:$0xff] }
  0x12   : > { %1358 = vmatpush1.bf16.msra.mxu1 %v1357_v39  ;;  %1344 = vmatprep.subr.bf16.mxu0 %v1343_v40  ;;  %v299_v55 = vld [vmem:[%s1616_s15 + $0x20] sm:$0xff]  ;;  %v300_v56 = vld [vmem:[%s1616_s15 + $0x28] sm:$0xff]  ;;  %v281_v57 = vld [vmem:[%s1639_s29 + $0x10] sm:$0xff] }
  0x13   : > { %1360 = vmatprep.subr.bf16.mxu1 %v1359_v44  ;;  %1044 = vrot.lane.b32.xlu1 %v296_v50, %s1478_s26  ;;  %v301_v58 = vld [vmem:[%s1616_s15 + $0x30] sm:$0xff]  ;;  %v302_v59 = vld [vmem:[%s1616_s15 + $0x38] sm:$0xff]  ;;  %v303_v61 = vld [vmem:[%s1616_s15 + $0x40] sm:$0xff] }
  0x14   : > { %v282_v60 = vld [vmem:[%s1639_s29 + $0x18] sm:$0xff]  ;;  %v304_v62 = vld [vmem:[%s1616_s15 + $0x48] sm:$0xff]  ;;  %v283_v63 = vld [vmem:[%s1639_s29 + $0x20] sm:$0xff] }
  0x15   : > { %1346 = vmatpush1.bf16.msra.mxu0 %v1345_v48  ;;  %1046 = vrot.lane.b32.xlu0 %v297_v51, %s1478_s26  ;;  %v305_v0 = vld [vmem:[%s1616_s15 + $0x50] sm:$0xff]  ;;  %v306_v1 = vld [vmem:[%s1616_s15 + $0x58] sm:$0xff]  ;;  %v284_v2 = vld [vmem:[%s1639_s29 + $0x28] sm:$0xff] }
  0x16   : > { %1362 = vmatpush1.bf16.msra.mxu1 %v1361_v49  ;;  %v307_v3 = vld [vmem:[%s1616_s15 + $0x60] sm:$0xff]  ;;  %v308_v4 = vld [vmem:[%s1616_s15 + $0x68] sm:$0xff]  ;;  %v285_v5 = vld [vmem:[%s1639_s29 + $0x30] sm:$0xff] }
  0x17   : > { %1048 = vrot.lane.b32.xlu1 %v298_v53, %s1478_s26  ;;  %v286_v6 = vld [vmem:[%s1639_s29 + $0x38] sm:$0xff]  ;;  %v287_v8 = vld [vmem:[%s1639_s29 + $0x40] sm:$0xff]  ;;  %v288_v9 = vld [vmem:[%s1639_s29 + $0x48] sm:$0xff] }
  0x18   : > { %1281 = vmatmul.mubr.msk.f32.vlgmr.msra.gmra.mrb[0].mxu0 %vm356_vm0, %v279_v52  ;;  %v289_v10 = vld [vmem:[%s1639_s29 + $0x50] sm:$0xff]  ;;  %v290_v11 = vld [vmem:[%s1639_s29 + $0x58] sm:$0xff]  ;;  %v291_v12 = vld [vmem:[%s1639_s29 + $0x60] sm:$0xff] }
  0x19   : > { %1297 = vmatmul.mubr.msk.f32.vlgmr.msra.gmra.mrb[0].mxu1 %vm356_vm0, %v295_v47  ;;  %475 = vmatprep.mubr.f32.mxu0 %v1477_v7  ;;  %v292_v13 = vld [vmem:[%s1639_s29 + $0x68] sm:$0xff]  ;;  %v293_v14 = vld [vmem:[%s1639_s29 + $0x70] sm:$0xff]  ;;  %v294_v16 = vld [vmem:[%s1639_s29 + $0x78] sm:$0xff] }
  0x1a   : > { %695 = vmatprep.mubr.f32.mxu1 %v1477_v7  ;;  %1050 = vrot.lane.b32.xlu0 %v299_v55, %s1478_s26  ;;  %v1739_v15 = vld [vmem:[%s1616_s15 + $0x70] sm:$0xff]  ;;  %v1748_v17 = vld [vmem:[%s1616_s15 + $0x78] sm:$0xff]  ;;  %v1759_v21 = vld [vmem:[%s2113_s5] sm:$0x3] }
  0x1b   : > { %1052 = vrot.lane.b32.xlu1 %v300_v56, %s1478_s26  ;;  %v1767_v22 = vrot.slane %v1759_v21, %v348_v20 }
  0x1c   : > { %1282 = vmatmul.mubr.msk.f32.gmra.mrb[2].mxu0 %vm356_vm0, %v280_v54 }
  0x1d   : > { %1298 = vmatmul.mubr.msk.f32.gmra.mrb[2].mxu1 %vm356_vm0, %v296_v50  ;;  %481 = vmatprep.mubr.f32.mxu0 %v1477_v7 }
  0x1e   : > { %701 = vmatprep.mubr.f32.mxu1 %v1477_v7  ;;  %1054 = vrot.lane.b32.xlu0 %v301_v58, %s1478_s26 }
  0x1f   : > { %1056 = vrot.lane.b32.xlu1 %v302_v59, %s1478_s26 }
  0x20   : > { %1283 = vmatmul.mubr.msk.f32.gmra.mrb[4].mxu0 %vm356_vm0, %v281_v57 }
  0x21   : > { %1299 = vmatmul.mubr.msk.f32.gmra.mrb[4].mxu1 %vm356_vm0, %v297_v51  ;;  %487 = vmatprep.mubr.f32.mxu0 %v1477_v7 }
  0x22   : > { %707 = vmatprep.mubr.f32.mxu1 %v1477_v7  ;;  %1058 = vrot.lane.b32.xlu0 %v303_v61, %s1478_s26 }
  0x23   : > { %1060 = vrot.lane.b32.xlu1 %v304_v62, %s1478_s26 }
  0x24   : > { %1284 = vmatmul.mubr.msk.f32.gmra.mrb[6].mxu0 %vm356_vm0, %v282_v60 }
  0x25   : > { %1300 = vmatmul.mubr.msk.f32.gmra.mrb[6].mxu1 %vm356_vm0, %v298_v53  ;;  %493 = vmatprep.mubr.f32.mxu0 %v1477_v7 }
  0x26   : > { %713 = vmatprep.mubr.f32.mxu1 %v1477_v7  ;;  %1062 = vrot.lane.b32.xlu0 %v305_v0, %s1478_s26 }
  0x27   : > { %1064 = vrot.lane.b32.xlu1 %v306_v1, %s1478_s26 }
  0x28   : > { %1285 = vmatmul.mubr.msk.f32.gmra.mrb[8].mxu0 %vm356_vm0, %v283_v63 }
  0x29   : > { %1301 = vmatmul.mubr.msk.f32.gmra.mrb[8].mxu1 %vm356_vm0, %v299_v55  ;;  %499 = vmatprep.mubr.f32.mxu0 %v1477_v7 }
  0x2a   : > { %719 = vmatprep.mubr.f32.mxu1 %v1477_v7  ;;  %1066 = vrot.lane.b32.xlu0 %v307_v3, %s1478_s26 }
  0x2b   : > { %1068 = vrot.lane.b32.xlu1 %v308_v4, %s1478_s26 }
  0x2c   : > { %1286 = vmatmul.mubr.msk.f32.gmra.mrb[10].mxu0 %vm356_vm0, %v284_v2 }
  0x2d   : > { %1302 = vmatmul.mubr.msk.f32.gmra.mrb[10].mxu1 %vm356_vm0, %v300_v56  ;;  %505 = vmatprep.mubr.f32.mxu0 %v1477_v7 }
  0x2e   : > { %725 = vmatprep.mubr.f32.mxu1 %v1477_v7 }
  0x30   : > { %1287 = vmatmul.mubr.msk.f32.gmra.mrb[12].mxu0 %vm356_vm0, %v285_v5 }
  0x31   : > { %1303 = vmatmul.mubr.msk.f32.gmra.mrb[12].mxu1 %vm356_vm0, %v301_v58  ;;  %511 = vmatprep.mubr.f32.mxu0 %v1477_v7 }
  0x32   : > { %731 = vmatprep.mubr.f32.mxu1 %v1477_v7 }
  0x34   : > { %1288 = vmatmul.mubr.msk.f32.gmra.mrb[14].mxu0 %vm356_vm0, %v286_v6  ;;  %v352_v6 = vsub.s32 1, %v1753_v19 }
  0x35   : > { %1304 = vmatmul.mubr.msk.f32.gmra.mrb[14].mxu1 %vm356_vm0, %v302_v59  ;;  %517 = vmatprep.mubr.f32.mxu0 %v1477_v7 }
  0x36   : > { %737 = vmatprep.mubr.f32.mxu1 %v1477_v7 }
  0x38   : > { %1289 = vmatmul.mubr.msk.f32.gmra.mrb[16].mxu0 %vm356_vm0, %v287_v8 }
  0x39   : > { %1305 = vmatmul.mubr.msk.f32.gmra.mrb[16].mxu1 %vm356_vm0, %v303_v61  ;;  %523 = vmatprep.mubr.f32.mxu0 %v1477_v7 }
  0x3a   : > { %743 = vmatprep.mubr.f32.mxu1 %v1477_v7 }
  0x3c   : > { %1290 = vmatmul.mubr.msk.f32.gmra.mrb[18].mxu0 %vm356_vm0, %v288_v9 }
  0x3d   : > { %1306 = vmatmul.mubr.msk.f32.gmra.mrb[18].mxu1 %vm356_vm0, %v304_v62  ;;  %529 = vmatprep.mubr.f32.mxu0 %v1477_v7 }
  0x3e   : > { %749 = vmatprep.mubr.f32.mxu1 %v1477_v7 }
  0x40   : > { %1291 = vmatmul.mubr.msk.f32.gmra.mrb[20].mxu0 %vm356_vm0, %v289_v10 }
  0x41   : > { %1307 = vmatmul.mubr.msk.f32.gmra.mrb[20].mxu1 %vm356_vm0, %v305_v0  ;;  %535 = vmatprep.mubr.f32.mxu0 %v1477_v7 }
  0x42   : > { %755 = vmatprep.mubr.f32.mxu1 %v1477_v7 }
  0x44   : > { %1292 = vmatmul.mubr.msk.f32.gmra.mrb[22].mxu0 %vm356_vm0, %v290_v11 }
  0x45   : > { %1308 = vmatmul.mubr.msk.f32.gmra.mrb[22].mxu1 %vm356_vm0, %v306_v1  ;;  %541 = vmatprep.mubr.f32.mxu0 %v1477_v7 }
  0x46   : > { %761 = vmatprep.mubr.f32.mxu1 %v1477_v7 }
  0x48   : > { %1293 = vmatmul.mubr.msk.f32.gmra.mrb[24].mxu0 %vm356_vm0, %v291_v12 }
  0x49   : > { %1309 = vmatmul.mubr.msk.f32.gmra.mrb[24].mxu1 %vm356_vm0, %v307_v3  ;;  %547 = vmatprep.mubr.f32.mxu0 %v1477_v7 }
  0x4a   : > { %767 = vmatprep.mubr.f32.mxu1 %v1477_v7 }
  0x4c   : > { %1294 = vmatmul.mubr.msk.f32.gmra.mrb[26].mxu0 %vm356_vm0, %v292_v13 }
  0x4d   : > { %1310 = vmatmul.mubr.msk.f32.gmra.mrb[26].mxu1 %vm356_vm0, %v308_v4  ;;  %553 = vmatprep.mubr.f32.mxu0 %v1477_v7 }
  0x4e   : > { %773 = vmatprep.mubr.f32.mxu1 %v1477_v7 }
  0x50   : > { %1295 = vmatmul.mubr.msk.f32.gmra.mrb[28].mxu0 %vm356_vm0, %v293_v14 }
  0x51   : > { %1311 = vmatmul.mubr.msk.f32.gmra.mrb[28].mxu1 %vm356_vm0, %v1739_v15  ;;  %559 = vmatprep.mubr.f32.mxu0 %v1477_v7 }
  0x52   : > { %779 = vmatprep.mubr.f32.mxu1 %v1477_v7  ;;  %v1764_v7 = vld [vmem:[%s2114_s6] sm:$0x3] }
  0x53   : > { %v1770_v23 = vrot.slane %v1764_v7, %v348_v20 }
  0x54   : > { %1296 = vmatmul.mubr.msk.f32.gmra.mrb[30].mxu0 %vm356_vm0, %v294_v16 }
  0x55   : > { %1312 = vmatmul.mubr.msk.f32.gmra.mrb[30].mxu1 %vm356_vm0, %v1748_v17 }
  0xeb   : > { %v471_v24 = vpop.f32.mrb[0].mxu0 }
  0xec   : > { %v472_v25 = vadd.f32 %v471_v24, %v1767_v22  ;;  %v691_v26 = vpop.f32.mrb[0].mxu1  ;;  %v1773_v27 = vpop.f32.mrb[1].mxu0  ;;  %v1813_v24 = vrot.slane %v1764_v7, %v352_v6 }
  0xed   : > { %v692_v28 = vadd.f32 %v691_v26, %v1770_v23  ;;  %v1776_v29 = vpop.f32.mrb[1].mxu1 }
  0xef   : > { %v786_v30 = vadd.f32 %v692_v28, %v472_v25  ;;  %v477_v31 = vpop.f32.mrb[2].mxu0 }
  0xf0   : > { %v478_v32 = vadd.f32 %v477_v31, %v1767_v22  ;;  %v697_v33 = vpop.f32.mrb[2].mxu1  ;;  %v1779_v34 = vpop.f32.mrb[3].mxu0 }
  0xf1   : > { %v1313_v35 = vmul.f32 -1.442695, %v786_v30  ;;  %v698_v36 = vadd.f32 %v697_v33, %v1770_v23  ;;  %v1782_v37 = vpop.f32.mrb[3].mxu1  ;;  %v1819_v30 = vrot.slane %v1759_v21, %v352_v6 }
  0xf3   : > { %1373 = vpow2.f32 %v1313_v35  ;;  %v787_v38 = vadd.f32 %v698_v36, %v478_v32  ;;  %v483_v39 = vpop.f32.mrb[4].mxu0 }
  0xf4   : > { %v484_v40 = vadd.f32 %v483_v39, %v1767_v22  ;;  %v703_v41 = vpop.f32.mrb[4].mxu1  ;;  %v1785_v42 = vpop.f32.mrb[5].mxu0 }
  0xf5   : > { %v1314_v43 = vmul.f32 -1.442695, %v787_v38  ;;  %v704_v44 = vadd.f32 %v703_v41, %v1770_v23  ;;  %v1788_v45 = vpop.f32.mrb[5].mxu1  ;;  %v694_v38 = vadd.f32 %v1776_v29, %v1813_v24 }
  0xf7   : > { %1375 = vpow2.f32 %v1314_v43  ;;  %v788_v46 = vadd.f32 %v704_v44, %v484_v40  ;;  %v489_v47 = vpop.f32.mrb[6].mxu0  ;;  %v474_v44 = vadd.f32 %v1773_v27, %v1819_v30 }
  0xf8   : > { %v490_v48 = vadd.f32 %v489_v47, %v1767_v22  ;;  %v709_v49 = vpop.f32.mrb[6].mxu1  ;;  %v1791_v50 = vpop.f32.mrb[7].mxu0 }
  0xf9   : > { %v1315_v51 = vmul.f32 -1.442695, %v788_v46  ;;  %v710_v52 = vadd.f32 %v709_v49, %v1770_v23  ;;  %v1794_v53 = vpop.f32.mrb[7].mxu1 }
  0xfb   : > { %1377 = vpow2.f32 %v1315_v51  ;;  %v789_v54 = vadd.f32 %v710_v52, %v490_v48  ;;  %v495_v55 = vpop.f32.mrb[8].mxu0 }
  0xfc   : > { %v496_v56 = vadd.f32 %v495_v55, %v1767_v22  ;;  %v715_v57 = vpop.f32.mrb[8].mxu1  ;;  %v1797_v58 = vpop.f32.mrb[9].mxu0  ;;  %v700_v55 = vadd.f32 %v1782_v37, %v1813_v24 }
  0xfd   : > { %v1374_v59 = vpop.eup %1373  ;;  %v1316_v60 = vmul.f32 -1.442695, %v789_v54  ;;  %v716_v61 = vadd.f32 %v715_v57, %v1770_v23  ;;  %v1800_v62 = vpop.f32.mrb[9].mxu1 }
  0xfe   : > { %v850_v63 = vadd.f32 1.0, %v1374_v59 }
  0xff   : > { %1379 = vpow2.f32 %v1316_v60  ;;  %v790_v0 = vadd.f32 %v716_v61, %v496_v56  ;;  %v501_v1 = vpop.f32.mrb[10].mxu0  ;;  %v480_v61 = vadd.f32 %v1779_v34, %v1819_v30 }
 0x100   : > { %1381 = vrcp.f32 %v850_v63  ;;  %v502_v2 = vadd.f32 %v501_v1, %v1767_v22  ;;  %v721_v3 = vpop.f32.mrb[10].mxu1  ;;  %v1803_v4 = vpop.f32.mrb[11].mxu0 }
 0x101   : > { %v1376_v5 = vpop.eup %1375  ;;  %v1317_v8 = vmul.f32 -1.442695, %v790_v0  ;;  %v722_v9 = vadd.f32 %v721_v3, %v1770_v23  ;;  %v1807_v10 = vpop.f32.mrb[11].mxu1 }
 0x102   : > { %v851_v11 = vadd.f32 1.0, %v1376_v5 }
 0x103   : > { %1383 = vpow2.f32 %v1317_v8  ;;  %v791_v12 = vadd.f32 %v722_v9, %v502_v2  ;;  %v507_v13 = vpop.f32.mrb[12].mxu0  ;;  %v706_v2 = vadd.f32 %v1788_v45, %v1813_v24  ;;  %v486_v45 = vadd.f32 %v1785_v42, %v1819_v30 }
 0x104   : > { %1385 = vrcp.f32 %v851_v11  ;;  %v508_v14 = vadd.f32 %v507_v13, %v1767_v22  ;;  %v727_v16 = vpop.f32.mrb[12].mxu1  ;;  %v1810_v18 = vpop.f32.mrb[13].mxu0 }
 0x105   : > { %v1378_v20 = vpop.eup %1377  ;;  %v1318_v19 = vmul.f32 -1.442695, %v791_v12  ;;  %v728_v25 = vadd.f32 %v727_v16, %v1770_v23  ;;  %v1816_v26 = vpop.f32.mrb[13].mxu1 }
 0x106   : > { %v852_v28 = vadd.f32 1.0, %v1378_v20 }
 0x107   : > { %1387 = vpow2.f32 %v1318_v19  ;;  %v792_v31 = vadd.f32 %v728_v25, %v508_v14  ;;  %v513_v32 = vpop.f32.mrb[14].mxu0  ;;  %v712_v19 = vadd.f32 %v1794_v53, %v1813_v24  ;;  %v492_v53 = vadd.f32 %v1791_v50, %v1819_v30 }
 0x108   : > { %1389 = vrcp.f32 %v852_v28  ;;  %v514_v33 = vadd.f32 %v513_v32, %v1767_v22  ;;  %v733_v35 = vpop.f32.mrb[14].mxu1  ;;  %v1822_v36 = vpop.f32.mrb[15].mxu0 }
 0x109   : > { %v1380_v7 = vpop.eup %1379  ;;  %v1319_v39 = vmul.f32 -1.442695, %v792_v31  ;;  %v734_v40 = vadd.f32 %v733_v35, %v1770_v23  ;;  %v1827_v41 = vpop.f32.mrb[15].mxu1 }
 0x10a   : > { %v1829_v21 = vpop.eup %1381  ;;  %v853_v43 = vadd.f32 1.0, %v1380_v7 }
 0x10b   : > { %v898_v46 = vmul.f32 %v1829_v21, %v694_v38  ;;  %1391 = vpow2.f32 %v1319_v39  ;;  %v793_v47 = vadd.f32 %v734_v40, %v514_v33  ;;  %v519_v48 = vpop.f32.mrb[16].mxu0 }
 0x10c   : > { %1393 = vrcp.f32 %v853_v43  ;;  %v520_v49 = vadd.f32 %v519_v48, %v1767_v22  ;;  %v739_v29 = vpop.f32.mrb[16].mxu1  ;;  %v1835_v51 = vpop.f32.mrb[17].mxu0 }
 0x10d   : > { %v1384_v52 = vpop.eup %1383  ;;  %v914_v54 = vadd.f32 %v898_v46, %v474_v44  ;;  %v1320_v56 = vmul.f32 -1.442695, %v793_v47  ;;  %v740_v57 = vadd.f32 %v739_v29, %v1770_v23  ;;  %v1840_v27 = vpop.f32.mrb[17].mxu1  ;;  %v718_v46 = vadd.f32 %v1800_v62, %v1813_v24 }
 0x10e   : > { %v1842_v59 = vpop.eup %1385  ;;  %v854_v60 = vadd.f32 1.0, %v1384_v52  ;;  %v498_v62 = vadd.f32 %v1797_v58, %v1819_v30 }
 0x10f   : > { %1395 = vtanh.f32 %v914_v54  ;;  %v899_v63 = vmul.f32 %v1842_v59, %v700_v55  ;;  %v794_v0 = vadd.f32 %v740_v57, %v520_v49  ;;  %v525_v1 = vpop.f32.mrb[18].mxu0 }
 0x110   : > { %1397 = vrcp.f32 %v854_v60  ;;  %v526_v37 = vadd.f32 %v525_v1, %v1767_v22  ;;  %v745_v3 = vpop.f32.mrb[18].mxu1  ;;  %v1850_v5 = vpop.f32.mrb[19].mxu0 }
 0x111   : > { %v1388_v6 = vpop.eup %1387  ;;  %v915_v8 = vadd.f32 %v899_v63, %v480_v61  ;;  %1399 = vpow2.f32 %v1320_v56  ;;  %v1321_v9 = vmul.f32 -1.442695, %v794_v0  ;;  %v746_v11 = vadd.f32 %v745_v3, %v1770_v23  ;;  %v1853_v34 = vpop.f32.mrb[19].mxu1 }
 0x112   : > { %v1855_v12 = vpop.eup %1389  ;;  %v855_v13 = vadd.f32 1.0, %v1388_v6 }
 0x113   : > { %1401 = vtanh.f32 %v915_v8  ;;  %v900_v14 = vmul.f32 %v1855_v12, %v706_v2  ;;  %v795_v16 = vadd.f32 %v746_v11, %v526_v37  ;;  %v531_v20 = vpop.f32.mrb[20].mxu0  ;;  %v724_v8 = vadd.f32 %v1807_v10, %v1813_v24 }
 0x114   : > { %1403 = vrcp.f32 %v855_v13  ;;  %v532_v25 = vadd.f32 %v531_v20, %v1767_v22  ;;  %v751_v28 = vpop.f32.mrb[20].mxu1  ;;  %v1863_v31 = vpop.f32.mrb[21].mxu0 }
 0x115   : > { %v1392_v32 = vpop.eup %1391  ;;  %v916_v33 = vadd.f32 %v900_v14, %v486_v45  ;;  %1405 = vpow2.f32 %v1321_v9  ;;  %v1322_v35 = vmul.f32 -1.442695, %v795_v16  ;;  %v752_v7 = vadd.f32 %v751_v28, %v1770_v23  ;;  %v1866_v42 = vpop.f32.mrb[21].mxu1 }
 0x116   : > { %v1868_v38 = vpop.eup %1393  ;;  %v856_v39 = vadd.f32 1.0, %v1392_v32  ;;  %v504_v14 = vadd.f32 %v1803_v4, %v1819_v30 }
 0x117   : > { %1407 = vtanh.f32 %v916_v33  ;;  %v901_v40 = vmul.f32 %v1868_v38, %v712_v19  ;;  %v796_v43 = vadd.f32 %v752_v7, %v532_v25  ;;  %v537_v44 = vpop.f32.mrb[22].mxu0  ;;  %v730_v7 = vadd.f32 %v1816_v26, %v1813_v24 }
 0x118   : > { %1409 = vrcp.f32 %v856_v39  ;;  %v538_v47 = vadd.f32 %v537_v44, %v1767_v22  ;;  %v757_v48 = vpop.f32.mrb[22].mxu1  ;;  %v1876_v49 = vpop.f32.mrb[23].mxu0  ;;  %v510_v44 = vadd.f32 %v1810_v18, %v1819_v30  ;;  %v736_v18 = vadd.f32 %v1827_v41, %v1813_v24 }
 0x119   : > { %v1396_v29 = vpop.eup %1395  ;;  %v917_v52 = vadd.f32 %v901_v40, %v492_v53  ;;  %1411 = vpow2.f32 %v1322_v35  ;;  %v1323_v54 = vmul.f32 -1.442695, %v796_v43  ;;  %v758_v55 = vadd.f32 %v757_v48, %v1770_v23  ;;  %v1879_v50 = vpop.f32.mrb[23].mxu1 }
 0x11a   : > { %v1881_v56 = vpop.eup %1397  ;;  %978 = vrot.lane.b32.xlu0 %v1396_v29, %s1478_s26 }
 0x11b   : > { %v1400_v57 = vpop.eup %1399  ;;  %1413 = vtanh.f32 %v917_v52  ;;  %v902_v60 = vmul.f32 %v1881_v56, %v718_v46  ;;  %v797_v61 = vadd.f32 %v758_v55, %v538_v47  ;;  %v543_v63 = vpop.f32.mrb[24].mxu0 }
 0x11c   : > { %v857_v0 = vadd.f32 1.0, %v1400_v57  ;;  %1415 = vpow2.f32 %v1323_v54  ;;  %v544_v1 = vadd.f32 %v543_v63, %v1767_v22  ;;  %v763_v2 = vpop.f32.mrb[24].mxu1  ;;  %v1888_v37 = vpop.f32.mrb[25].mxu0 }
 0x11d   : > { %v1402_v3 = vpop.eup %1401  ;;  %v918_v6 = vadd.f32 %v902_v60, %v498_v62  ;;  %v1324_v9 = vmul.f32 -1.442695, %v797_v61  ;;  %v764_v11 = vadd.f32 %v763_v2, %v1770_v23  ;;  %v1893_v58 = vpop.f32.mrb[25].mxu1 }
 0x11e   : > { %v1895_v13 = vpop.eup %1403  ;;  %1417 = vrcp.f32 %v857_v0  ;;  %980 = vrot.lane.b32.xlu0 %v1402_v3, %s1478_s26 }
 0x11f   : > { %v1406_v45 = vpop.eup %1405  ;;  %1419 = vtanh.f32 %v918_v6  ;;  %v903_v16 = vmul.f32 %v1895_v13, %v724_v8  ;;  %v798_v20 = vadd.f32 %v764_v11, %v544_v1  ;;  %v549_v19 = vpop.f32.mrb[26].mxu0 }
 0x120   : > { %v858_v10 = vadd.f32 1.0, %v1406_v45  ;;  %1421 = vpow2.f32 %v1324_v9  ;;  %v550_v25 = vadd.f32 %v549_v19, %v1767_v22  ;;  %v769_v28 = vpop.f32.mrb[26].mxu1  ;;  %v1902_v32 = vpop.f32.mrb[27].mxu0  ;;  %v516_v45 = vadd.f32 %v1822_v36, %v1819_v30 }
 0x121   : > { %v1408_v33 = vpop.eup %1407  ;;  %v919_v35 = vadd.f32 %v903_v16, %v504_v14  ;;  %v1325_v39 = vmul.f32 -1.442695, %v798_v20  ;;  %v770_v53 = vadd.f32 %v769_v28, %v1770_v23  ;;  %v1907_v4 = vpop.f32.mrb[27].mxu1 }
 0x122   : > { %v1909_v40 = vpop.eup %1409  ;;  %1423 = vrcp.f32 %v858_v10  ;;  %982 = vrot.lane.b32.xlu1 %v1408_v33, %s1478_s26 }
 0x123   : > { %v1412_v43 = vpop.eup %1411  ;;  %1425 = vtanh.f32 %v919_v35  ;;  %v904_v46 = vmul.f32 %v1909_v40, %v730_v7  ;;  %v799_v47 = vadd.f32 %v770_v53, %v550_v25  ;;  %v555_v48 = vpop.f32.mrb[28].mxu0  ;;  %v522_v35 = vadd.f32 %v1835_v51, %v1819_v30 }
 0x124   : > { %v859_v26 = vadd.f32 1.0, %v1412_v43  ;;  %1427 = vpow2.f32 %v1325_v39  ;;  %v556_v29 = vadd.f32 %v555_v48, %v1767_v22  ;;  %v775_v52 = vpop.f32.mrb[28].mxu1  ;;  %v1916_v54 = vpop.f32.mrb[29].mxu0  ;;  %v528_v51 = vadd.f32 %v1850_v5, %v1819_v30 }
 0x125   : > { %v1414_v55 = vpop.eup %1413  ;;  %v920_v57 = vadd.f32 %v904_v46, %v510_v44  ;;  %v1326_v62 = vmul.f32 -1.442695, %v799_v47  ;;  %v776_v60 = vadd.f32 %v775_v52, %v1770_v23  ;;  %v1919_v61 = vpop.f32.mrb[29].mxu1 }
 0x126   : > { %v1416_v63 = vpop.eup %1415  ;;  %1429 = vrcp.f32 %v859_v26  ;;  %984 = vrot.lane.b32.xlu1 %v1414_v55, %s1478_s26  ;;  %v754_v26 = vadd.f32 %v1866_v42, %v1813_v24  ;;  %v534_v55 = vadd.f32 %v1863_v31, %v1819_v30  ;;  %v760_v42 = vadd.f32 %v1879_v50, %v1813_v24 }
 0x127   : > { %1431 = vtanh.f32 %v920_v57  ;;  %v860_v0 = vadd.f32 1.0, %v1416_v63  ;;  %v800_v1 = vadd.f32 %v776_v60, %v556_v29  ;;  %v561_v2 = vpop.f32.mrb[30].mxu0  ;;  %v546_v50 = vadd.f32 %v1888_v37, %v1819_v30 }
 0x128   : > { %v1924_v3 = vpop.eup %1417  ;;  %1433 = vpow2.f32 %v1326_v62  ;;  %v562_v6 = vadd.f32 %v561_v2, %v1767_v22  ;;  %v781_v8 = vpop.f32.mrb[30].mxu1  ;;  %v742_v22 = vadd.f32 %v1840_v27, %v1813_v24  ;;  %v748_v27 = vadd.f32 %v1853_v34, %v1813_v24 }
 0x129   : > { %v1927_v9 = vpop.f32.mrb[31].mxu0  ;;  %v1420_v11 = vpop.eup %1419  ;;  %v905_v14 = vmul.f32 %v1924_v3, %v736_v18  ;;  %1435 = vrcp.f32 %v860_v0  ;;  %v1327_v16 = vmul.f32 -1.442695, %v800_v1  ;;  %v782_v19 = vadd.f32 %v781_v8, %v1770_v23 }
 0x12a   : > { %v1932_v41 = vpop.f32.mrb[31].mxu1  ;;  %v1422_v20 = vpop.eup %1421  ;;  %986 = vrot.lane.b32.xlu0 %v1420_v11, %s1478_s26  ;;  %v540_v0 = vadd.f32 %v1876_v49, %v1819_v30  ;;  %v766_v8 = vadd.f32 %v1893_v58, %v1813_v24  ;;  %v552_v58 = vadd.f32 %v1902_v32, %v1819_v30  ;;  %v778_v37 = vadd.f32 %v1919_v61, %v1813_v24 }
 0x12b   : > { %v921_v10 = vadd.f32 %v905_v14, %v516_v45  ;;  %v861_v25 = vadd.f32 1.0, %v1422_v20  ;;  %1437 = vpow2.f32 %v1327_v16  ;;  %v801_v36 = vadd.f32 %v782_v19, %v562_v6 }
 0x12c   : > { %v1938_v28 = vpop.eup %1423  ;;  %v772_v20 = vadd.f32 %v1907_v4, %v1813_v24  ;;  %v558_v4 = vadd.f32 %v1916_v54, %v1819_v30  ;;  %v784_v32 = vadd.f32 %v1932_v41, %v1813_v24  ;;  %v564_v61 = vadd.f32 %v1927_v9, %v1819_v30  ;;  %v1043_v30 = vpop.permute.xlu0 %1042 }
 0x12d   : > { %v1426_v33 = vpop.eup %1425  ;;  %1439 = vtanh.f32 %v921_v10  ;;  %v906_v7 = vmul.f32 %v1938_v28, %v742_v22  ;;  %v1328_v23 = vmul.f32 -1.442695, %v801_v36  ;;  %v1045_v41 = vpop.permute.xlu1 %1044 }
 0x12e   : > { %v1428_v39 = vpop.eup %1427  ;;  %1441 = vrcp.f32 %v861_v25  ;;  %988 = vrot.lane.b32.xlu1 %v1426_v33, %s1478_s26 }
 0x12f   : > { %v922_v53 = vadd.f32 %v906_v7, %v522_v35  ;;  %v862_v43 = vadd.f32 1.0, %v1428_v39  ;;  %1443 = vpow2.f32 %v1328_v23 }
 0x130   : > { %v1946_v44 = vpop.eup %1429  ;;  %v1047_v9 = vpop.permute.xlu0 %1046 }
 0x131   : > { %v1432_v46 = vpop.eup %1431  ;;  %1445 = vtanh.f32 %v922_v53  ;;  %v907_v47 = vmul.f32 %v1946_v44, %v748_v27 }
 0x132   : > { %v1434_v48 = vpop.eup %1433  ;;  %1447 = vrcp.f32 %v862_v43  ;;  %990 = vrot.lane.b32.xlu0 %v1432_v46, %s1478_s26 }
 0x133   : > { %v1954_v29 = vpop.eup %1435  ;;  %v923_v34 = vadd.f32 %v907_v47, %v528_v51  ;;  %v863_v52 = vadd.f32 1.0, %v1434_v48  ;;  %v1049_v51 = vpop.permute.xlu1 %1048 }
 0x134   : > { %v908_v57 = vmul.f32 %v1954_v29, %v754_v26  ;;  %v1051_v46 = vpop.permute.xlu0 %1050 }
 0x135   : > { %v1438_v62 = vpop.eup %1437  ;;  %1449 = vtanh.f32 %v923_v34 }
 0x136   : > { %v924_v5 = vadd.f32 %v908_v57, %v534_v55  ;;  %1451 = vrcp.f32 %v863_v52  ;;  %v864_v60 = vadd.f32 1.0, %v1438_v62 }
 0x137   : > { %v1440_v63 = vpop.eup %1439  ;;  %v1053_v48 = vpop.permute.xlu1 %1052 }
 0x138   : > { %v1961_v18 = vpop.eup %1441  ;;  %1453 = vtanh.f32 %v924_v5  ;;  %992 = vrot.lane.b32.xlu1 %v1440_v63, %s1478_s26  ;;  %v1055_v47 = vpop.permute.xlu0 %1054 }
 0x139   : > { %v909_v31 = vmul.f32 %v1961_v18, %v760_v42  ;;  %1455 = vrcp.f32 %v864_v60  ;;  %v1444_v1 = vpop.eup %1443  ;;  %v947_v42 = vsub.f32 1.0, %v1842_v59 }
 0x13a   : > { %v865_v11 = vadd.f32 1.0, %v1444_v1  ;;  %v1091_v1 = vmul.f32 %v1842_v59, %v1045_v41 }
 0x13b   : > { %v1446_v2 = vpop.eup %1445  ;;  %v925_v6 = vadd.f32 %v909_v31, %v540_v0  ;;  %v1057_v34 = vpop.permute.xlu1 %1056 }
 0x13c   : > { %v1969_v45 = vpop.eup %1447  ;;  %994 = vrot.lane.b32.xlu0 %v1446_v2, %s1478_s26  ;;  %v1059_v26 = vpop.permute.xlu0 %1058 }
 0x13d   : > { %1457 = vtanh.f32 %v925_v6  ;;  %v910_v49 = vmul.f32 %v1969_v45, %v766_v8  ;;  %v948_v8 = vsub.f32 1.0, %v1855_v12  ;;  %v1098_v41 = vmul.f32 %v1938_v28, %v1059_v26 }
 0x13e   : > { %1459 = vrcp.f32 %v865_v11 }
 0x13f   : > { %v1450_v14 = vpop.eup %1449  ;;  %v926_v16 = vadd.f32 %v910_v49, %v546_v50  ;;  %v1061_v55 = vpop.permute.xlu1 %1060  ;;  %v1092_v50 = vmul.f32 %v1855_v12, %v1047_v9 }
 0x140   : > { %v1977_v19 = vpop.eup %1451  ;;  %996 = vrot.lane.b32.xlu1 %v1450_v14, %s1478_s26  ;;  %v2007_v52 = vpop.permute.xlu0 %1062  ;;  %v949_v14 = vsub.f32 1.0, %v1868_v38 }
 0x141   : > { %1461 = vtanh.f32 %v926_v16  ;;  %v911_v10 = vmul.f32 %v1977_v19, %v772_v20  ;;  %v1093_v20 = vmul.f32 %v1868_v38, %v1049_v51  ;;  %v955_v51 = vsub.f32 1.0, %v1946_v44 }
 0x142   : > { %v1454_v22 = vpop.eup %1453 }
 0x143   : > { %v1985_v25 = vpop.eup %1455  ;;  %v927_v36 = vadd.f32 %v911_v10, %v552_v58  ;;  %998 = vrot.lane.b32.xlu0 %v1454_v22, %s1478_s26  ;;  %v2012_v62 = vpop.permute.xlu1 %1064  ;;  %v950_v10 = vsub.f32 1.0, %v1881_v56 }
 0x144   : > { %v912_v33 = vmul.f32 %v1985_v25, %v778_v37  ;;  %v2009_v57 = vpop.permute.xlu0 %1066  ;;  %v1094_v37 = vmul.f32 %v1881_v56, %v1051_v46 }
 0x145   : > { %1463 = vtanh.f32 %v927_v36 }
 0x146   : > { %v928_v35 = vadd.f32 %v912_v33, %v558_v4  ;;  %v951_v4 = vsub.f32 1.0, %v1895_v13 }
 0x147   : > { %v1458_v7 = vpop.eup %1457  ;;  %v2016_v0 = vpop.permute.xlu1 %1068 }
 0x148   : > { %v1993_v39 = vpop.eup %1459  ;;  %1465 = vtanh.f32 %v928_v35  ;;  %1000 = vrot.lane.b32.xlu1 %v1458_v7, %s1478_s26  ;;  %v1095_v35 = vmul.f32 %v1895_v13, %v1053_v48  ;;  %v1097_v13 = vmul.f32 %v1924_v3, %v1057_v34  ;;  %v1099_v48 = vmul.f32 %v1946_v44, %v1061_v55 }
 0x149   : > { %v913_v23 = vmul.f32 %v1993_v39, %v784_v32  ;;  %v952_v32 = vsub.f32 1.0, %v1909_v40  ;;  %v1101_v44 = vmul.f32 %v1961_v18, %v2012_v62 }
 0x14b   : > { %v1462_v53 = vpop.eup %1461  ;;  %v929_v54 = vadd.f32 %v913_v23, %v564_v61  ;;  %v1096_v23 = vmul.f32 %v1909_v40, %v1055_v47 }
 0x14c   : > { %1002 = vrot.lane.b32.xlu0 %v1462_v53, %s1478_s26 }
 0x14d   : > { %1467 = vtanh.f32 %v929_v54  ;;  %v953_v54 = vsub.f32 1.0, %v1924_v3  ;;  %v956_v3 = vsub.f32 1.0, %v1954_v29 }
 0x14f   : > { %v1464_v27 = vpop.eup %1463 }
 0x150   : > { %1004 = vrot.lane.b32.xlu1 %v1464_v27, %s1478_s26 }
 0x152   : > { %v1466_v43 = vpop.eup %1465 }
 0x153   : > { %1006 = vrot.lane.b32.xlu0 %v1466_v43, %s1478_s26 }
 0x157   : > { %v1468_v24 = vpop.eup %1467  ;;  %1070 = vrot.lane.b32.xlu0 %v1739_v15, %s1478_s26  ;;  %v946_v15 = vsub.f32 1.0, %v1829_v21 }
 0x158   : > { %1008 = vrot.lane.b32.xlu1 %v1468_v24, %s1478_s26 }
 0x15c   : > { %1072 = vrot.lane.b32.xlu1 %v1748_v17, %s1478_s26  ;;  %v1090_v17 = vmul.f32 %v1829_v21, %v1043_v30  ;;  %v954_v30 = vsub.f32 1.0, %v1938_v28 }
 0x18c   : > { %v979_v5 = vpop.permute.xlu0 %978 }
 0x18d   : > { %v1026_v60 = vmul.f32 %v979_v5, %v946_v15 }
 0x18f   : > { %v1106_v63 = vadd.f32 %v1090_v17, %v1026_v60  ;;  %v1100_v17 = vmul.f32 %v1954_v29, %v2007_v52  ;;  %v957_v60 = vsub.f32 1.0, %v1961_v18  ;;  %v1102_v29 = vmul.f32 %v1969_v45, %v2009_v57 }
 0x190   : > { %v981_v31 = vpop.permute.xlu0 %980 }
 0x191   : > { %v1027_v2 = vmul.f32 %v981_v31, %v947_v42  ;;  %1138 = vrot.lane.b32.xlu0 %v1106_v63, %s1478_s26  ;;  %v958_v31 = vsub.f32 1.0, %v1969_v45  ;;  %v960_v45 = vsub.f32 1.0, %v1985_v25 }
 0x193   : > { %v1107_v6 = vadd.f32 %v1091_v1, %v1027_v2 }
 0x194   : > { %v983_v11 = vpop.permute.xlu1 %982 }
 0x195   : > { %v1028_v49 = vmul.f32 %v983_v11, %v948_v8  ;;  %1140 = vrot.lane.b32.xlu1 %v1107_v6, %s1478_s26  ;;  %v959_v6 = vsub.f32 1.0, %v1977_v19  ;;  %v1103_v11 = vmul.f32 %v1977_v19, %v2016_v0 }
 0x197   : > { %v1108_v21 = vadd.f32 %v1092_v50, %v1028_v49 }
 0x198   : > { %v985_v16 = vpop.permute.xlu1 %984 }
 0x199   : > { %v1029_v58 = vmul.f32 %v985_v16, %v949_v14  ;;  %1142 = vrot.lane.b32.xlu0 %v1108_v21, %s1478_s26 }
 0x19b   : > { %v1109_v59 = vadd.f32 %v1093_v20, %v1029_v58  ;;  %v961_v20 = vsub.f32 1.0, %v1993_v39 }
 0x19c   : > { %v987_v22 = vpop.permute.xlu0 %986 }
 0x19d   : > { %v1030_v36 = vmul.f32 %v987_v22, %v950_v10  ;;  %1144 = vrot.lane.b32.xlu1 %v1109_v59, %s1478_s26 }
 0x19f   : > { %v1110_v12 = vadd.f32 %v1094_v37, %v1030_v36 }
 0x1a0   : > { %v989_v33 = vpop.permute.xlu1 %988 }
 0x1a1   : > { %v1031_v7 = vmul.f32 %v989_v33, %v951_v4  ;;  %1146 = vrot.lane.b32.xlu0 %v1110_v12, %s1478_s26 }
 0x1a3   : > { %v1111_v38 = vadd.f32 %v1095_v35, %v1031_v7 }
 0x1a4   : > { %v991_v61 = vpop.permute.xlu0 %990 }
 0x1a5   : > { %v1032_v53 = vmul.f32 %v991_v61, %v952_v32  ;;  %1148 = vrot.lane.b32.xlu1 %v1111_v38, %s1478_s26 }
 0x1a7   : > { %v1112_v56 = vadd.f32 %v1096_v23, %v1032_v53 }
 0x1a9   : > { %1150 = vrot.lane.b32.xlu0 %v1112_v56, %s1478_s26 }
 0x1aa   : > { %v993_v27 = vpop.permute.xlu1 %992 }
 0x1ab   : > { %v1033_v43 = vmul.f32 %v993_v27, %v953_v54 }
 0x1ad   : > { %v1113_v24 = vadd.f32 %v1097_v13, %v1033_v43 }
 0x1ae   : > { %v995_v9 = vpop.permute.xlu0 %994 }
 0x1af   : > { %v1034_v46 = vmul.f32 %v995_v9, %v954_v30  ;;  %1152 = vrot.lane.b32.xlu1 %v1113_v24, %s1478_s26 }
 0x1b1   : > { %v1114_v40 = vadd.f32 %v1098_v41, %v1034_v46 }
 0x1b2   : > { %v997_v47 = vpop.permute.xlu1 %996 }
 0x1b3   : > { %v1035_v15 = vmul.f32 %v997_v47, %v955_v51  ;;  %1154 = vrot.lane.b32.xlu0 %v1114_v40, %s1478_s26 }
 0x1b5   : > { %v1115_v34 = vadd.f32 %v1099_v48, %v1035_v15  ;;  %v999_v5 = vpop.permute.xlu0 %998 }
 0x1b6   : > { %v1036_v28 = vmul.f32 %v999_v5, %v956_v3 }
 0x1b7   : > { %1156 = vrot.lane.b32.xlu1 %v1115_v34, %s1478_s26 }
 0x1b8   : > { %v1116_v26 = vadd.f32 %v1100_v17, %v1036_v28 }
 0x1ba   : > { %v1001_v63 = vpop.permute.xlu1 %1000  ;;  %1158 = vrot.lane.b32.xlu0 %v1116_v26, %s1478_s26 }
 0x1bb   : > { %v1037_v55 = vmul.f32 %v1001_v63, %v957_v60 }
 0x1bd   : > { %v1117_v42 = vadd.f32 %v1101_v44, %v1037_v55 }
 0x1be   : > { %v1003_v1 = vpop.permute.xlu0 %1002 }
 0x1bf   : > { %v1038_v52 = vmul.f32 %v1003_v1, %v958_v31  ;;  %1160 = vrot.lane.b32.xlu1 %v1117_v42, %s1478_s26 }
 0x1c1   : > { %v1118_v2 = vadd.f32 %v1102_v29, %v1038_v52 }
 0x1c2   : > { %v1005_v8 = vpop.permute.xlu1 %1004 }
 0x1c3   : > { %v1039_v50 = vmul.f32 %v1005_v8, %v959_v6  ;;  %1162 = vrot.lane.b32.xlu0 %v1118_v2, %s1478_s26 }
 0x1c5   : > { %v1119_v18 = vadd.f32 %v1103_v11, %v1039_v50  ;;  %v1007_v62 = vpop.permute.xlu0 %1006 }
 0x1c6   : > { %v1040_v49 = vmul.f32 %v1007_v62, %v960_v45 }
 0x1c7   : > { %1164 = vrot.lane.b32.xlu1 %v1119_v18, %s1478_s26 }
 0x1c9   : > { %v1071_v57 = vpop.permute.xlu0 %1070 }
 0x1ca   : > { %v1009_v21 = vpop.permute.xlu1 %1008  ;;  %v1104_v14 = vmul.f32 %v1985_v25, %v1071_v57 }
 0x1cb   : > { %v1041_v19 = vmul.f32 %v1009_v21, %v961_v20 }
 0x1cc   : > { %v1120_v16 = vadd.f32 %v1104_v14, %v1040_v49 }
 0x1ce   : > { %v1073_v58 = vpop.permute.xlu1 %1072  ;;  %1166 = vrot.lane.b32.xlu0 %v1120_v16, %s1478_s26 }
 0x1cf   : > { %v1105_v0 = vmul.f32 %v1993_v39, %v1073_v58 }
 0x1d1   : > { %v1121_v59 = vadd.f32 %v1105_v0, %v1041_v19 }
 0x1d3   : > { %1168 = vrot.lane.b32.xlu1 %v1121_v59, %s1478_s26 }
 0x203   : > { %v1139_v25 = vpop.permute.xlu0 %1138 }
 0x204   : > { %1186 = vst.msk [vmem:[%s2071_s14] sm:$0xff] %vm356_vm0, %v1139_v25 }
 0x207   : > { %v1141_v39 = vpop.permute.xlu1 %1140 }
 0x208   : > { %1187 = vst.msk [vmem:[%s2071_s14 + $0x8] sm:$0xff] %vm356_vm0, %v1141_v39 }
 0x20b   : > { %v1143_v10 = vpop.permute.xlu0 %1142 }
 0x20c   : > { %1188 = vst.msk [vmem:[%s2071_s14 + $0x10] sm:$0xff] %vm356_vm0, %v1143_v10 }
 0x20f   : > { %v1145_v22 = vpop.permute.xlu1 %1144 }
 0x210   : > { %1189 = vst.msk [vmem:[%s2071_s14 + $0x18] sm:$0xff] %vm356_vm0, %v1145_v22 }
 0x213   : > { %v1147_v37 = vpop.permute.xlu0 %1146 }
 0x214   : > { %1190 = vst.msk [vmem:[%s2071_s14 + $0x20] sm:$0xff] %vm356_vm0, %v1147_v37 }
 0x217   : > { %v1149_v36 = vpop.permute.xlu1 %1148 }
 0x218   : > { %1191 = vst.msk [vmem:[%s2071_s14 + $0x28] sm:$0xff] %vm356_vm0, %v1149_v36 }
 0x21b   : > { %v1151_v12 = vpop.permute.xlu0 %1150 }
 0x21c   : > { %1192 = vst.msk [vmem:[%s2071_s14 + $0x30] sm:$0xff] %vm356_vm0, %v1151_v12 }
 0x221   : > { %v1153_v4 = vpop.permute.xlu1 %1152 }
 0x222   : > { %1193 = vst.msk [vmem:[%s2071_s14 + $0x38] sm:$0xff] %vm356_vm0, %v1153_v4 }
 0x225   : > { %v1155_v33 = vpop.permute.xlu0 %1154 }
 0x226   : > { %1194 = vst.msk [vmem:[%s2071_s14 + $0x40] sm:$0xff] %vm356_vm0, %v1155_v33 }
 0x229   : > { %v1157_v35 = vpop.permute.xlu1 %1156 }
 0x22a   : > { %1195 = vst.msk [vmem:[%s2071_s14 + $0x48] sm:$0xff] %vm356_vm0, %v1157_v35 }
 0x22c   : > { %v1159_v7 = vpop.permute.xlu0 %1158 }
 0x22d   : > { %1196 = vst.msk [vmem:[%s2071_s14 + $0x50] sm:$0xff] %vm356_vm0, %v1159_v7 }
 0x231   : > { %v1161_v38 = vpop.permute.xlu1 %1160 }
 0x232   : > { %1197 = vst.msk [vmem:[%s2071_s14 + $0x58] sm:$0xff] %vm356_vm0, %v1161_v38 }
 0x235   : > { %v1163_v32 = vpop.permute.xlu0 %1162 }
 0x236   : > { %1198 = vst.msk [vmem:[%s2071_s14 + $0x60] sm:$0xff] %vm356_vm0, %v1163_v32 }
 0x239   : > { %v1165_v61 = vpop.permute.xlu1 %1164 }
 0x23a   : > { %1199 = vst.msk [vmem:[%s2071_s14 + $0x68] sm:$0xff] %vm356_vm0, %v1165_v61 }
 0x240   : > { %v1167_v23 = vpop.permute.xlu0 %1166 }
 0x241   : > { %1200 = vst.msk [vmem:[%s2071_s14 + $0x70] sm:$0xff] %vm356_vm0, %v1167_v23 }
 0x245   : > { %v1169_v53 = vpop.permute.xlu1 %1168 }
 0x246   : > { %1201 = vst.msk [vmem:[%s2071_s14 + $0x78] sm:$0xff] %vm356_vm0, %v1169_v53 }
 0x247 PF: > { %s18_s23 = sadd.s32 1, %s1475_s23  }
 0x248   : > { %p15_p4 = scmp.ge.s32.totalorder %s18_s23, 4  }
 0x24a   :  { %17 = sbr.rel (!%p15_p4) target bundleno = 1 (0x1), region = 77 }

</bundles_post_ra>
